<compile_context>
chip_gen: v7x
topology: tpu7x:2x2x1
jax: 0.10.0
libtpu: 0.0.40
codegen_flags: <defaults>
</compile_context>

<pallas_src>
import functools

import jax
import jax.numpy as jnp
import numpy as np
from jax.experimental import pallas as pl
from jax.experimental.pallas import tpu as pltpu

EPS = 1e-5
PAD = 128                 # lane width of packed weight output columns / vector rows
MAX_SINGLE_BLOCK_BATCH = 4096   # conservative whole-batch-in-VMEM guard

# ---------------------------------------------------------------------------
# Packed weight blob layout: one (240, 128) f32 array, rows = real fan-in.
# ---------------------------------------------------------------------------
_W_LAYOUT = [("w_in", 16), ("w1a", 32), ("w1b", 32), ("w2a", 32),
             ("w2b", 48), ("wsk", 32), ("w_out", 48)]
W_OFFS = {}
_off = 0
for _name, _rows in _W_LAYOUT:
    W_OFFS[_name] = (_off, _rows)
    _off += _rows
W_TOTAL_ROWS = _off        # 240 (multiple of 8, sublane aligned)

# Packed vector blob: one (16, 128) f32 array (13 real rows, padded to 16).
_VEC_NAMES = ["b_in", "g1a", "bt1a", "g1b", "bt1b", "b1b",
              "g2a", "bt2a", "g2b", "bt2b", "gout", "btout", "b_out"]
V_IDX = {n: i for i, n in enumerate(_VEC_NAMES)}
N_VEC_ROWS = 16


# ---------------------------------------------------------------------------
# Pallas kernel: whole forward pass in VMEM; 3 compact inputs, true-width output.
# ---------------------------------------------------------------------------
def _rffn_kernel(x_ref, w_ref, vec_ref, o_ref, *, out_dim):
    vecs = vec_ref[...]                       # (16, 128): one load, static slices after

    def row(name):
        i = V_IDX[name]
        return vecs[i:i + 1, :]               # (1, 128)

    def mm(a, name):
        off, k = W_OFFS[name]
        lhs = a if a.shape[-1] == k else a[:, :k]          # static lane slice (from 0)
        rhs = w_ref[off:off + k, :]                         # static sublane-aligned slice
        return jnp.dot(lhs, rhs, preferred_element_type=jnp.float32)

    def batchnorm(x, gname, bname):
        # training-mode BN over batch rows (sublane axis), biased variance,
        # two-pass variance (matches reference numerics), folded into one affine.
        mean = jnp.mean(x, axis=0, keepdims=True)           # (1, 128)
        xc = x - mean
        var = jnp.mean(xc * xc, axis=0, keepdims=True)      # (1, 128)
        scale = row(gname) * jax.lax.rsqrt(var + EPS)       # (1, 128)
        return xc * scale + row(bname)

    x = x_ref[...]                            # (N, 16) raw input, no padding

    # input layer (bias kept: it feeds the identity skip path)
    h = mm(x, "w_in") + row("b_in")           # (N, 128), lanes >= 32 are zero

    # --- identity residual block (pre-activation) ---
    t = jnp.maximum(batchnorm(h, "g1a", "bt1a"), 0.0)
    t = mm(t, "w1a")                          # b1a dropped: cancels in the next BN
    t = jnp.maximum(batchnorm(t, "g1b", "bt1b"), 0.0)
    t = mm(t, "w1b") + row("b1b")             # b1b kept: feeds the dense-block skip
    h = t + h

    # --- dense residual block with linear skip (two small dots, no concats) ---
    t = jnp.maximum(batchnorm(h, "g2a", "bt2a"), 0.0)
    t = mm(t, "w2a")                          # b2a dropped: cancels in the next BN
    t = jnp.maximum(batchnorm(t, "g2b", "bt2b"), 0.0)
    # (b2b + bsk) dropped: they cancel in the output BN's mean subtraction.
    h = mm(t, "w2b") + mm(h, "wsk")

    # output BN (dropout is None -> skipped) + output layer; store true width only.
    h = batchnorm(h, "gout", "btout")
    y = mm(h, "w_out")                        # (N, 128), only first out_dim cols real
    o_ref[...] = y[:, :out_dim] + row("b_out")[:, :out_dim]


@functools.partial(jax.jit, static_argnames=("out_dim",))
def residual_ffn_forward(x, w_blob, vec_blob, *, out_dim):
    n, _ = x.shape
    # TODO(synk): replace this guard with a gridded two-pass-BN path for large N.
    assert n <= MAX_SINGLE_BLOCK_BATCH, (
        "single-block whole-batch BN path; add the gridded two-pass BN path for "
        f"batch > {MAX_SINGLE_BLOCK_BATCH}")
    return pl.pallas_call(
        functools.partial(_rffn_kernel, out_dim=out_dim),
        out_shape=jax.ShapeDtypeStruct((n, out_dim), jnp.float32),
        in_specs=[pl.BlockSpec(memory_space=pltpu.MemorySpace.VMEM)] * 3,
        out_specs=pl.BlockSpec(memory_space=pltpu.MemorySpace.VMEM),
    )(x.astype(jnp.float32), w_blob, vec_blob)


# ---------------------------------------------------------------------------
# Parameter packing: one (240,128) weight blob + one (16,128) vector blob.
# ---------------------------------------------------------------------------
def pack_params(p):
    w_blob = np.zeros((W_TOTAL_ROWS, PAD), np.float32)
    for name, _rows in _W_LAYOUT:
        off, k = W_OFFS[name]
        w = np.asarray(p[name], np.float32)
        assert w.shape[0] == k
        w_blob[off:off + k, : w.shape[1]] = w
    vec_blob = np.zeros((N_VEC_ROWS, PAD), np.float32)
    for name in _VEC_NAMES:
        v = np.asarray(p[name], np.float32).reshape(-1)
        vec_blob[V_IDX[name], : v.shape[0]] = v
    return jnp.asarray(w_blob), jnp.asarray(vec_blob)


# ---------------------------------------------------------------------------
# Pure-JAX reference (mirrors the PyTorch forward exactly, all biases included).
# ---------------------------------------------------------------------------
def _bn_ref(x, g, b):
    m = x.mean(axis=0, keepdims=True)
    v = ((x - m) ** 2).mean(axis=0, keepdims=True)
    return g * (x - m) / jnp.sqrt(v + EPS) + b


def residual_ffn_reference(x, p):
    h = x @ p["w_in"] + p["b_in"]
    # identity block
    skip = h
    t = jnp.maximum(_bn_ref(h, p["g1a"], p["bt1a"]), 0.0) @ p["w1a"] + p["b1a"]
    t = jnp.maximum(_bn_ref(t, p["g1b"], p["bt1b"]), 0.0) @ p["w1b"] + p["b1b"]
    h = t + skip
    # dense block
    skip = h @ p["wsk"] + p["bsk"]
    t = jnp.maximum(_bn_ref(h, p["g2a"], p["bt2a"]), 0.0) @ p["w2a"] + p["b2a"]
    t = jnp.maximum(_bn_ref(t, p["g2b"], p["bt2b"]), 0.0) @ p["w2b"] + p["b2b"]
    h = t + skip
    h = _bn_ref(h, p["gout"], p["btout"])
    return h @ p["w_out"] + p["b_out"]


# ---------------------------------------------------------------------------
# Deterministic parameter construction (PyTorch-like uniform(-1/sqrt(fan_in), ..))
# ---------------------------------------------------------------------------
def _linear_init(key, fan_in, fan_out):
    kw, kb = jax.random.split(key)
    bound = 1.0 / np.sqrt(fan_in)
    w = jax.random.uniform(kw, (fan_in, fan_out), jnp.float32, -bound, bound)
    b = jax.random.uniform(kb, (1, fan_out), jnp.float32, -bound, bound)
    return w, b


def make_params(key, input_dim=16, h0=32, h1=32, h2=48, output_dim=8):
    keys = jax.random.split(key, 8)
    p = {}
    p["w_in"], p["b_in"] = _linear_init(keys[0], input_dim, h0)
    # identity block: 32 -> (hidden 32) -> 32
    p["g1a"], p["bt1a"] = jnp.ones((1, h0), jnp.float32), jnp.zeros((1, h0), jnp.float32)
    p["w1a"], p["b1a"] = _linear_init(keys[1], h0, h1)
    p["g1b"], p["bt1b"] = jnp.ones((1, h1), jnp.float32), jnp.zeros((1, h1), jnp.float32)
    p["w1b"], p["b1b"] = _linear_init(keys[2], h1, h1)
    # dense block: 32 -> (hidden 48) -> 48, with linear skip 32 -> 48
    p["wsk"], p["bsk"] = _linear_init(keys[3], h1, h2)
    p["g2a"], p["bt2a"] = jnp.ones((1, h1), jnp.float32), jnp.zeros((1, h1), jnp.float32)
    p["w2a"], p["b2a"] = _linear_init(keys[4], h1, h2)
    p["g2b"], p["bt2b"] = jnp.ones((1, h2), jnp.float32), jnp.zeros((1, h2), jnp.float32)
    p["w2b"], p["b2b"] = _linear_init(keys[5], h2, h2)
    # output BN + output layer
    p["gout"], p["btout"] = jnp.ones((1, h2), jnp.float32), jnp.zeros((1, h2), jnp.float32)
    p["w_out"], p["b_out"] = _linear_init(keys[6], h2, output_dim)
    return p


if __name__ == "__main__":
    key = jax.random.PRNGKey(0)
    kx, kp = jax.random.split(key)

    batch, input_dim, output_dim = 64, 16, 8
    x = jax.random.normal(kx, (batch, input_dim), jnp.float32)
    params = make_params(kp, input_dim=input_dim, output_dim=output_dim)
    w_blob, vec_blob = pack_params(params)

    out = residual_ffn_forward(x, w_blob, vec_blob, out_dim=output_dim)
    out = jax.block_until_ready(out)

    ref = residual_ffn_reference(x, params)
    np.testing.assert_allclose(np.asarray(out), np.asarray(ref), rtol=1e-4, atol=1e-4)

    print("KERNEL_OK")
</pallas_src>

<mosaic_0001>
module attributes {stable_mosaic.version = 11 : i64} {
  func.func @_rffn_kernel(%arg0: memref<64x16xf32, #tpu.memory_space<vmem>>, %arg1: memref<240x128xf32, #tpu.memory_space<vmem>>, %arg2: memref<16x128xf32, #tpu.memory_space<vmem>>, %arg3: memref<64x8xf32, #tpu.memory_space<vmem>>) attributes {dimension_semantics = [], scalar_prefetch = 0 : i64, scratch_operands = 0 : i64, tpu.core_type = #tpu.core_type<tc>} {
    %c0 = arith.constant 0 : index
    %c0_0 = arith.constant 0 : index
    %0 = vector.load %arg2[%c0, %c0_0] : memref<16x128xf32, #tpu.memory_space<vmem>>, vector<16x128xf32>
    %c0_1 = arith.constant 0 : index
    %c0_2 = arith.constant 0 : index
    %1 = vector.load %arg0[%c0_1, %c0_2] : memref<64x16xf32, #tpu.memory_space<vmem>>, vector<64x16xf32>
    %c0_3 = arith.constant 0 : index
    %c0_4 = arith.constant 0 : index
    %2 = vector.load %arg1[%c0_3, %c0_4] : memref<240x128xf32, #tpu.memory_space<vmem>>, vector<16x128xf32>
    %cst = arith.constant dense<0.000000e+00> : vector<64x128xf32>
    %3 = tpu.matmul %1, %2, %cst {dimension_numbers = #tpu.dot_dimension_numbers<[1], [0], [0], [1], [0, 0, 1, 1], [], []>} : vector<64x16xf32>, vector<16x128xf32>, vector<64x128xf32> -> vector<64x128xf32>
    %4 = vector.extract_strided_slice %0 {offsets = [0, 0], sizes = [1, 128], strides = [1, 1]} : vector<16x128xf32> to vector<1x128xf32>
    %5 = vector.broadcast %4 : vector<1x128xf32> to vector<64x128xf32>
    %6 = arith.addf %3, %5 : vector<64x128xf32>
    %cst_5 = arith.constant dense<0.000000e+00> : vector<128xf32>
    %7 = vector.multi_reduction <add>, %6, %cst_5 [0] : vector<64x128xf32> to vector<128xf32>
    %8 = vector.shape_cast %7 : vector<128xf32> to vector<1x128xf32>
    %cst_6 = arith.constant 6.400000e+01 : f32
    %9 = vector.broadcast %cst_6 : f32 to vector<1x128xf32>
    %10 = arith.divf %8, %9 : vector<1x128xf32>
    %11 = vector.broadcast %10 : vector<1x128xf32> to vector<64x128xf32>
    %12 = arith.subf %6, %11 : vector<64x128xf32>
    %13 = arith.mulf %12, %12 : vector<64x128xf32>
    %cst_7 = arith.constant dense<0.000000e+00> : vector<128xf32>
    %14 = vector.multi_reduction <add>, %13, %cst_7 [0] : vector<64x128xf32> to vector<128xf32>
    %15 = vector.shape_cast %14 : vector<128xf32> to vector<1x128xf32>
    %cst_8 = arith.constant 6.400000e+01 : f32
    %16 = vector.broadcast %cst_8 : f32 to vector<1x128xf32>
    %17 = arith.divf %15, %16 : vector<1x128xf32>
    %18 = vector.extract_strided_slice %0 {offsets = [1, 0], sizes = [1, 128], strides = [1, 1]} : vector<16x128xf32> to vector<1x128xf32>
    %cst_9 = arith.constant 9.99999974E-6 : f32
    %19 = vector.broadcast %cst_9 : f32 to vector<1x128xf32>
    %20 = arith.addf %17, %19 : vector<1x128xf32>
    %21 = math.rsqrt %20 : vector<1x128xf32>
    %22 = arith.mulf %18, %21 : vector<1x128xf32>
    %23 = vector.broadcast %22 : vector<1x128xf32> to vector<64x128xf32>
    %24 = arith.mulf %12, %23 : vector<64x128xf32>
    %25 = vector.extract_strided_slice %0 {offsets = [2, 0], sizes = [1, 128], strides = [1, 1]} : vector<16x128xf32> to vector<1x128xf32>
    %26 = vector.broadcast %25 : vector<1x128xf32> to vector<64x128xf32>
    %27 = arith.addf %24, %26 : vector<64x128xf32>
    %cst_10 = arith.constant 0.000000e+00 : f32
    %28 = vector.broadcast %cst_10 : f32 to vector<64x128xf32>
    %29 = arith.maximumf %27, %28 : vector<64x128xf32>
    %30 = vector.extract_strided_slice %29 {offsets = [0, 0], sizes = [64, 32], strides = [1, 1]} : vector<64x128xf32> to vector<64x32xf32>
    %c16 = arith.constant 16 : index
    %c0_11 = arith.constant 0 : index
    %31 = vector.load %arg1[%c16, %c0_11] : memref<240x128xf32, #tpu.memory_space<vmem>>, vector<32x128xf32>
    %cst_12 = arith.constant dense<0.000000e+00> : vector<64x128xf32>
    %32 = tpu.matmul %30, %31, %cst_12 {dimension_numbers = #tpu.dot_dimension_numbers<[1], [0], [0], [1], [0, 0, 1, 1], [], []>} : vector<64x32xf32>, vector<32x128xf32>, vector<64x128xf32> -> vector<64x128xf32>
    %cst_13 = arith.constant dense<0.000000e+00> : vector<128xf32>
    %33 = vector.multi_reduction <add>, %32, %cst_13 [0] : vector<64x128xf32> to vector<128xf32>
    %34 = vector.shape_cast %33 : vector<128xf32> to vector<1x128xf32>
    %cst_14 = arith.constant 6.400000e+01 : f32
    %35 = vector.broadcast %cst_14 : f32 to vector<1x128xf32>
    %36 = arith.divf %34, %35 : vector<1x128xf32>
    %37 = vector.broadcast %36 : vector<1x128xf32> to vector<64x128xf32>
    %38 = arith.subf %32, %37 : vector<64x128xf32>
    %39 = arith.mulf %38, %38 : vector<64x128xf32>
    %cst_15 = arith.constant dense<0.000000e+00> : vector<128xf32>
    %40 = vector.multi_reduction <add>, %39, %cst_15 [0] : vector<64x128xf32> to vector<128xf32>
    %41 = vector.shape_cast %40 : vector<128xf32> to vector<1x128xf32>
    %cst_16 = arith.constant 6.400000e+01 : f32
    %42 = vector.broadcast %cst_16 : f32 to vector<1x128xf32>
    %43 = arith.divf %41, %42 : vector<1x128xf32>
    %44 = vector.extract_strided_slice %0 {offsets = [3, 0], sizes = [1, 128], strides = [1, 1]} : vector<16x128xf32> to vector<1x128xf32>
    %cst_17 = arith.constant 9.99999974E-6 : f32
    %45 = vector.broadcast %cst_17 : f32 to vector<1x128xf32>
    %46 = arith.addf %43, %45 : vector<1x128xf32>
    %47 = math.rsqrt %46 : vector<1x128xf32>
    %48 = arith.mulf %44, %47 : vector<1x128xf32>
    %49 = vector.broadcast %48 : vector<1x128xf32> to vector<64x128xf32>
    %50 = arith.mulf %38, %49 : vector<64x128xf32>
    %51 = vector.extract_strided_slice %0 {offsets = [4, 0], sizes = [1, 128], strides = [1, 1]} : vector<16x128xf32> to vector<1x128xf32>
    %52 = vector.broadcast %51 : vector<1x128xf32> to vector<64x128xf32>
    %53 = arith.addf %50, %52 : vector<64x128xf32>
    %cst_18 = arith.constant 0.000000e+00 : f32
    %54 = vector.broadcast %cst_18 : f32 to vector<64x128xf32>
    %55 = arith.maximumf %53, %54 : vector<64x128xf32>
    %56 = vector.extract_strided_slice %55 {offsets = [0, 0], sizes = [64, 32], strides = [1, 1]} : vector<64x128xf32> to vector<64x32xf32>
    %c48 = arith.constant 48 : index
    %c0_19 = arith.constant 0 : index
    %57 = vector.load %arg1[%c48, %c0_19] : memref<240x128xf32, #tpu.memory_space<vmem>>, vector<32x128xf32>
    %cst_20 = arith.constant dense<0.000000e+00> : vector<64x128xf32>
    %58 = tpu.matmul %56, %57, %cst_20 {dimension_numbers = #tpu.dot_dimension_numbers<[1], [0], [0], [1], [0, 0, 1, 1], [], []>} : vector<64x32xf32>, vector<32x128xf32>, vector<64x128xf32> -> vector<64x128xf32>
    %59 = vector.extract_strided_slice %0 {offsets = [5, 0], sizes = [1, 128], strides = [1, 1]} : vector<16x128xf32> to vector<1x128xf32>
    %60 = vector.broadcast %59 : vector<1x128xf32> to vector<64x128xf32>
    %61 = arith.addf %58, %60 : vector<64x128xf32>
    %62 = arith.addf %61, %6 : vector<64x128xf32>
    %cst_21 = arith.constant dense<0.000000e+00> : vector<128xf32>
    %63 = vector.multi_reduction <add>, %62, %cst_21 [0] : vector<64x128xf32> to vector<128xf32>
    %64 = vector.shape_cast %63 : vector<128xf32> to vector<1x128xf32>
    %cst_22 = arith.constant 6.400000e+01 : f32
    %65 = vector.broadcast %cst_22 : f32 to vector<1x128xf32>
    %66 = arith.divf %64, %65 : vector<1x128xf32>
    %67 = vector.broadcast %66 : vector<1x128xf32> to vector<64x128xf32>
    %68 = arith.subf %62, %67 : vector<64x128xf32>
    %69 = arith.mulf %68, %68 : vector<64x128xf32>
    %cst_23 = arith.constant dense<0.000000e+00> : vector<128xf32>
    %70 = vector.multi_reduction <add>, %69, %cst_23 [0] : vector<64x128xf32> to vector<128xf32>
    %71 = vector.shape_cast %70 : vector<128xf32> to vector<1x128xf32>
    %cst_24 = arith.constant 6.400000e+01 : f32
    %72 = vector.broadcast %cst_24 : f32 to vector<1x128xf32>
    %73 = arith.divf %71, %72 : vector<1x128xf32>
    %74 = vector.extract_strided_slice %0 {offsets = [6, 0], sizes = [1, 128], strides = [1, 1]} : vector<16x128xf32> to vector<1x128xf32>
    %cst_25 = arith.constant 9.99999974E-6 : f32
    %75 = vector.broadcast %cst_25 : f32 to vector<1x128xf32>
    %76 = arith.addf %73, %75 : vector<1x128xf32>
    %77 = math.rsqrt %76 : vector<1x128xf32>
    %78 = arith.mulf %74, %77 : vector<1x128xf32>
    %79 = vector.broadcast %78 : vector<1x128xf32> to vector<64x128xf32>
    %80 = arith.mulf %68, %79 : vector<64x128xf32>
    %81 = vector.extract_strided_slice %0 {offsets = [7, 0], sizes = [1, 128], strides = [1, 1]} : vector<16x128xf32> to vector<1x128xf32>
    %82 = vector.broadcast %81 : vector<1x128xf32> to vector<64x128xf32>
    %83 = arith.addf %80, %82 : vector<64x128xf32>
    %cst_26 = arith.constant 0.000000e+00 : f32
    %84 = vector.broadcast %cst_26 : f32 to vector<64x128xf32>
    %85 = arith.maximumf %83, %84 : vector<64x128xf32>
    %86 = vector.extract_strided_slice %85 {offsets = [0, 0], sizes = [64, 32], strides = [1, 1]} : vector<64x128xf32> to vector<64x32xf32>
    %c80 = arith.constant 80 : index
    %c0_27 = arith.constant 0 : index
    %87 = vector.load %arg1[%c80, %c0_27] : memref<240x128xf32, #tpu.memory_space<vmem>>, vector<32x128xf32>
    %cst_28 = arith.constant dense<0.000000e+00> : vector<64x128xf32>
    %88 = tpu.matmul %86, %87, %cst_28 {dimension_numbers = #tpu.dot_dimension_numbers<[1], [0], [0], [1], [0, 0, 1, 1], [], []>} : vector<64x32xf32>, vector<32x128xf32>, vector<64x128xf32> -> vector<64x128xf32>
    %cst_29 = arith.constant dense<0.000000e+00> : vector<128xf32>
    %89 = vector.multi_reduction <add>, %88, %cst_29 [0] : vector<64x128xf32> to vector<128xf32>
    %90 = vector.shape_cast %89 : vector<128xf32> to vector<1x128xf32>
    %cst_30 = arith.constant 6.400000e+01 : f32
    %91 = vector.broadcast %cst_30 : f32 to vector<1x128xf32>
    %92 = arith.divf %90, %91 : vector<1x128xf32>
    %93 = vector.broadcast %92 : vector<1x128xf32> to vector<64x128xf32>
    %94 = arith.subf %88, %93 : vector<64x128xf32>
    %95 = arith.mulf %94, %94 : vector<64x128xf32>
    %cst_31 = arith.constant dense<0.000000e+00> : vector<128xf32>
    %96 = vector.multi_reduction <add>, %95, %cst_31 [0] : vector<64x128xf32> to vector<128xf32>
    %97 = vector.shape_cast %96 : vector<128xf32> to vector<1x128xf32>
    %cst_32 = arith.constant 6.400000e+01 : f32
    %98 = vector.broadcast %cst_32 : f32 to vector<1x128xf32>
    %99 = arith.divf %97, %98 : vector<1x128xf32>
    %100 = vector.extract_strided_slice %0 {offsets = [8, 0], sizes = [1, 128], strides = [1, 1]} : vector<16x128xf32> to vector<1x128xf32>
    %cst_33 = arith.constant 9.99999974E-6 : f32
    %101 = vector.broadcast %cst_33 : f32 to vector<1x128xf32>
    %102 = arith.addf %99, %101 : vector<1x128xf32>
    %103 = math.rsqrt %102 : vector<1x128xf32>
    %104 = arith.mulf %100, %103 : vector<1x128xf32>
    %105 = vector.broadcast %104 : vector<1x128xf32> to vector<64x128xf32>
    %106 = arith.mulf %94, %105 : vector<64x128xf32>
    %107 = vector.extract_strided_slice %0 {offsets = [9, 0], sizes = [1, 128], strides = [1, 1]} : vector<16x128xf32> to vector<1x128xf32>
    %108 = vector.broadcast %107 : vector<1x128xf32> to vector<64x128xf32>
    %109 = arith.addf %106, %108 : vector<64x128xf32>
    %cst_34 = arith.constant 0.000000e+00 : f32
    %110 = vector.broadcast %cst_34 : f32 to vector<64x128xf32>
    %111 = arith.maximumf %109, %110 : vector<64x128xf32>
    %112 = vector.extract_strided_slice %111 {offsets = [0, 0], sizes = [64, 48], strides = [1, 1]} : vector<64x128xf32> to vector<64x48xf32>
    %c112 = arith.constant 112 : index
    %c0_35 = arith.constant 0 : index
    %113 = vector.load %arg1[%c112, %c0_35] : memref<240x128xf32, #tpu.memory_space<vmem>>, vector<48x128xf32>
    %cst_36 = arith.constant dense<0.000000e+00> : vector<64x128xf32>
    %114 = tpu.matmul %112, %113, %cst_36 {dimension_numbers = #tpu.dot_dimension_numbers<[1], [0], [0], [1], [0, 0, 1, 1], [], []>} : vector<64x48xf32>, vector<48x128xf32>, vector<64x128xf32> -> vector<64x128xf32>
    %115 = vector.extract_strided_slice %62 {offsets = [0, 0], sizes = [64, 32], strides = [1, 1]} : vector<64x128xf32> to vector<64x32xf32>
    %c160 = arith.constant 160 : index
    %c0_37 = arith.constant 0 : index
    %116 = vector.load %arg1[%c160, %c0_37] : memref<240x128xf32, #tpu.memory_space<vmem>>, vector<32x128xf32>
    %cst_38 = arith.constant dense<0.000000e+00> : vector<64x128xf32>
    %117 = tpu.matmul %115, %116, %cst_38 {dimension_numbers = #tpu.dot_dimension_numbers<[1], [0], [0], [1], [0, 0, 1, 1], [], []>} : vector<64x32xf32>, vector<32x128xf32>, vector<64x128xf32> -> vector<64x128xf32>
    %118 = arith.addf %114, %117 : vector<64x128xf32>
    %cst_39 = arith.constant dense<0.000000e+00> : vector<128xf32>
    %119 = vector.multi_reduction <add>, %118, %cst_39 [0] : vector<64x128xf32> to vector<128xf32>
    %120 = vector.shape_cast %119 : vector<128xf32> to vector<1x128xf32>
    %cst_40 = arith.constant 6.400000e+01 : f32
    %121 = vector.broadcast %cst_40 : f32 to vector<1x128xf32>
    %122 = arith.divf %120, %121 : vector<1x128xf32>
    %123 = vector.broadcast %122 : vector<1x128xf32> to vector<64x128xf32>
    %124 = arith.subf %118, %123 : vector<64x128xf32>
    %125 = arith.mulf %124, %124 : vector<64x128xf32>
    %cst_41 = arith.constant dense<0.000000e+00> : vector<128xf32>
    %126 = vector.multi_reduction <add>, %125, %cst_41 [0] : vector<64x128xf32> to vector<128xf32>
    %127 = vector.shape_cast %126 : vector<128xf32> to vector<1x128xf32>
    %cst_42 = arith.constant 6.400000e+01 : f32
    %128 = vector.broadcast %cst_42 : f32 to vector<1x128xf32>
    %129 = arith.divf %127, %128 : vector<1x128xf32>
    %130 = vector.extract_strided_slice %0 {offsets = [10, 0], sizes = [1, 128], strides = [1, 1]} : vector<16x128xf32> to vector<1x128xf32>
    %cst_43 = arith.constant 9.99999974E-6 : f32
    %131 = vector.broadcast %cst_43 : f32 to vector<1x128xf32>
    %132 = arith.addf %129, %131 : vector<1x128xf32>
    %133 = math.rsqrt %132 : vector<1x128xf32>
    %134 = arith.mulf %130, %133 : vector<1x128xf32>
    %135 = vector.broadcast %134 : vector<1x128xf32> to vector<64x128xf32>
    %136 = arith.mulf %124, %135 : vector<64x128xf32>
    %137 = vector.extract_strided_slice %0 {offsets = [11, 0], sizes = [1, 128], strides = [1, 1]} : vector<16x128xf32> to vector<1x128xf32>
    %138 = vector.broadcast %137 : vector<1x128xf32> to vector<64x128xf32>
    %139 = arith.addf %136, %138 : vector<64x128xf32>
    %140 = vector.extract_strided_slice %139 {offsets = [0, 0], sizes = [64, 48], strides = [1, 1]} : vector<64x128xf32> to vector<64x48xf32>
    %c192 = arith.constant 192 : index
    %c0_44 = arith.constant 0 : index
    %141 = vector.load %arg1[%c192, %c0_44] : memref<240x128xf32, #tpu.memory_space<vmem>>, vector<48x128xf32>
    %cst_45 = arith.constant dense<0.000000e+00> : vector<64x128xf32>
    %142 = tpu.matmul %140, %141, %cst_45 {dimension_numbers = #tpu.dot_dimension_numbers<[1], [0], [0], [1], [0, 0, 1, 1], [], []>} : vector<64x48xf32>, vector<48x128xf32>, vector<64x128xf32> -> vector<64x128xf32>
    %143 = vector.extract_strided_slice %142 {offsets = [0, 0], sizes = [64, 8], strides = [1, 1]} : vector<64x128xf32> to vector<64x8xf32>
    %144 = vector.extract_strided_slice %0 {offsets = [12, 0], sizes = [1, 128], strides = [1, 1]} : vector<16x128xf32> to vector<1x128xf32>
    %145 = vector.extract_strided_slice %144 {offsets = [0, 0], sizes = [1, 8], strides = [1, 1]} : vector<1x128xf32> to vector<1x8xf32>
    %146 = vector.broadcast %145 : vector<1x8xf32> to vector<64x8xf32>
    %147 = arith.addf %143, %146 : vector<64x8xf32>
    %c0_46 = arith.constant 0 : index
    %c0_47 = arith.constant 0 : index
    %148 = vector.load %arg3[%c0_46, %c0_47] : memref<64x8xf32, #tpu.memory_space<vmem>>, vector<64x8xf32>
    tpu.vector_store %arg3[%c0_46, %c0_47], %147 {strides = array<i32>} : memref<64x8xf32, #tpu.memory_space<vmem>>, vector<64x8xf32>,
    return
  }
}

</mosaic_0001>

<bundles_post_ra>
// kernel: residual_ffn_forward.1
= control target key start
LH: loop header
LB: loop body
LE: loop exit
PB: predicated region body
PF: predicated region fallthrough
CT: control target
= control target key end

     0   :  { %8 = vsyncpa [#allocation3], 0  ;;  %s1797_s12 = smov [#allocation2]   ;;  %s2041_s0 = inlined_call_operand.vmem [shape: f32[64,16], index: 0, kind: input, shape index: {}]   ;;  %s2042_s1 = inlined_call_operand.hbm [shape: f32[240,128], index: 1, kind: input, shape index: {}]   ;;  %s2043_s2 = inlined_call_operand.vmem [shape: f32[16,128], index: 2, kind: input, shape index: {}]   ;;  %s2044_s3 = inlined_call_operand.vmem [shape: f32[64,8], index: 3, kind: output, shape index: {}]  }
   0x1   :  { %s16_s13 = sshll.u32 %s1797_s12, 4  ;;  %s1773_s16 = scalar_lea.hbm %s2042_s1, 3840  ;;  %s17_s13 = int_to_ptr.vmem [resolvable:$true] %s16_s13 }
   0x2   :  { %p1774_p0 = scmp.ne.s32.totalorder %s2042_s1, %s1773_s16  ;;  %p1777_p1 = scmp.lt.u32.totalorder %s1773_s16, %s2042_s1 }
   0x4   :  { %p1779_p2 = pnand %p1777_p1, %p1774_p0 }
   0x6   :  { %1782 = shalt.err (!%p1779_p2)
}
   0x7   :  { %s1783_s21 = scalar_lea.vmem %s17_s13, 3840  ;;  %p1788_p4 = scmp.lt.s32.totalorder %s17_s13, %s17_s13 }
   0x8   :  { %p1784_p3 = scmp.ne.s32.totalorder %s17_s13, %s1783_s21  ;;  %p1789_p5 = scmp.lt.s32.totalorder %s1783_s21, %s1783_s21 }
   0xa   :  { %p1790_p6 = por %p1789_p5, %p1788_p4 }
   0xc   :  { %p1791_p7 = pnand %p1790_p6, %p1784_p3 }
   0xe   :  { %1794 = shalt.err (!%p1791_p7)
}
   0xf   :  { %s1798_s22 = smov 128   ;;  %s1799_s23 = smov 8  }
  0x10   :  { %22 = dma.hbm_to_vmem [thread:$0]  %s2042_s1, 3840, %s17_s13, [#allocation3], %s1798_s22, %s1798_s22, %s1799_s23  }
  0x11   :  { %1795 = dma.done.wait [#allocation3], 3840  }
  0x12   :  { %1796 = vsyncadd [#allocation3], 4294963456  ;;  %vm44_vm0 = vcmask 130048   ;;  %v38_v0 = vld [vmem:[#allocation2] sm:$0xff]  ;;  %v39_v1 = vld [vmem:[#allocation2 + $0x8] sm:$0xff]  ;;  %v40_v17 = vlaneseq  ;;  %vm258_vm1 = vcmask 261120  }
  0x13   :  { %v30_v2 = vld [vmem:[%s2041_s0] sm:$0xff]  ;;  %v1690_v3 = vpack.c.bf16 %v39_v1, %v38_v0  ;;  %v31_v5 = vld [vmem:[%s2041_s0 + $0x8] sm:$0xff]  ;;  %v32_v7 = vld [vmem:[%s2041_s0 + $0x10] sm:$0xff]  ;;  %vm1042_vm2 = vcmask 392192   ;;  %vm1390_vm3 = vcmask 64512  }
  0x14   :  { %1550 = vmatprep.mubr.msk.f32.mxu0 %vm44_vm0, %v30_v2  ;;  %v34_v4 = vld [vmem:[%s2041_s0 + $0x20] sm:$0xff]  ;;  %v35_v6 = vld [vmem:[%s2041_s0 + $0x28] sm:$0xff]  ;;  %v36_v8 = vld [vmem:[%s2041_s0 + $0x30] sm:$0xff]  ;;  %v1864_v18 = vshrl.u32 %v40_v17, 7 }
  0x15   :  { %1691 = vmatprep.subr.bf16.mxu0 %v1690_v3  ;;  %1750 = vmatprep.subr.bf16.mxu1 %v1690_v3  ;;  %v33_v9 = vld [vmem:[%s2041_s0 + $0x18] sm:$0xff]  ;;  %v254_v11 = vld [vmem:[#allocation2 + $0x10] sm:$0xff]  ;;  %v256_v14 = vld [vmem:[#allocation2 + $0x20] sm:$0xff] }
  0x16   :  { %1693 = vmatpush3.bf16.msra.mxu0 %v1690_v3  ;;  %1751 = vmatpush3.bf16.msra.mxu1 %v1690_v3  ;;  %v37_v10 = vld [vmem:[%s2041_s0 + $0x38] sm:$0xff]  ;;  %v257_v15 = vld [vmem:[#allocation2 + $0x28] sm:$0xff]  ;;  %v42_v19 = vsub.s32 0, %v1864_v18  ;;  %v1870_v20 = vld [vmem:[%s2043_s2] sm:$0xff] }
  0x17   :  { %1556 = vmatprep.mubr.msk.f32.mxu1 %vm44_vm0, %v34_v4  ;;  %v255_v12 = vld [vmem:[#allocation2 + $0x18] sm:$0xff]  ;;  %v1698_v16 = vpack.c.bf16 %v257_v15, %v256_v14 }
  0x18   :  { %v1694_v13 = vpack.c.bf16 %v255_v12, %v254_v11  ;;  %v43_v21 = vrot.slane %v1870_v20, %v42_v19 }
  0x19   :  { %1551 = vmatmul.mubr.msk.f32.vlgmr.msra.gmra.mrb[0].mxu0 %vm44_vm0, %v31_v5  ;;  %1557 = vmatmul.mubr.msk.f32.vlgmr.msra.gmra.mrb[0].mxu1 %vm44_vm0, %v35_v6 }
  0x1a   :  { %1553 = vmatprep.mubr.msk.f32.mxu0 %vm44_vm0, %v32_v7  ;;  %1559 = vmatprep.mubr.msk.f32.mxu1 %vm44_vm0, %v36_v8 }
  0x1b   :  { %1695 = vmatprep.subr.bf16.mxu1 %v1694_v13 }
  0x1c   :  { %1697 = vmatpush3.bf16.msra.mxu1 %v1694_v13 }
  0x1d   :  { %1554 = vmatmul.mubr.msk.f32.gmra.mrb[2].mxu0 %vm44_vm0, %v33_v9  ;;  %1560 = vmatmul.mubr.msk.f32.gmra.mrb[2].mxu1 %vm44_vm0, %v37_v10 }
  0x1e   :  { %1699 = vmatprep.subr.bf16.mxu1 %v1698_v16 }
  0x20   :  { %1701 = vmatpush3.bf16.msra.mxu1 %v1698_v16 }
  0xec   :  { %v1552_v22 = vpop.f32.mrb[0].mxu0  ;;  %v1558_v23 = vpop.f32.mrb[0].mxu1 }
  0xed   :  { %v135_v24 = vpop.f32.mrb[1].mxu0  ;;  %v155_v25 = vpop.f32.mrb[1].mxu1  ;;  %v1875_v26 = vadd.f32 %v1552_v22, %v43_v21  ;;  %v1889_v38 = vadd.f32 %v1558_v23, %v43_v21  ;;  %v224_v22 = vsub.s32 1, %v1864_v18  ;;  %v236_v23 = vsub.s32 2, %v1864_v18 }
  0xee   :  { %v1877_v27 = vadd.f32 %v135_v24, %v43_v21  ;;  %v1886_v36 = vadd.f32 %v155_v25, %v43_v21 }
  0xf0   :  { %v1555_v28 = vpop.f32.mrb[2].mxu0  ;;  %v1561_v29 = vpop.f32.mrb[2].mxu1  ;;  %v174_v32 = vadd.f32 %v1875_v26, %v1877_v27 }
  0xf1   :  { %v145_v30 = vpop.f32.mrb[3].mxu0  ;;  %v165_v31 = vpop.f32.mrb[3].mxu1  ;;  %v1883_v34 = vadd.f32 %v1555_v28, %v43_v21  ;;  %v1895_v42 = vadd.f32 %v1561_v29, %v43_v21  ;;  %v237_v29 = vrot.slane %v1870_v20, %v236_v23 }
  0xf2   :  { %v1881_v33 = vadd.f32 %v145_v30, %v43_v21  ;;  %v1892_v40 = vadd.f32 %v165_v31, %v43_v21 }
  0xf4   :  { %v175_v35 = vadd.f32 %v174_v32, %v1881_v33 }
  0xf6   :  { %v176_v37 = vadd.f32 %v175_v35, %v1883_v34 }
  0xf8   :  { %v177_v39 = vadd.f32 %v176_v37, %v1886_v36 }
  0xfa   :  { %v178_v41 = vadd.f32 %v177_v39, %v1889_v38 }
  0xfc   :  { %v179_v43 = vadd.f32 %v178_v41, %v1892_v40 }
  0xfe   :  { %v180_v44 = vadd.f32 %v179_v43, %v1895_v42 }
 0x100   :  { %v181_v45 = vrot.slane %v180_v44, 4 }
 0x102   :  { %v182_v46 = vadd.f32 %v181_v45, %v180_v44 }
 0x104   :  { %v183_v47 = vrot.slane %v182_v46, 2 }
 0x106   :  { %v184_v48 = vadd.f32 %v183_v47, %v182_v46 }
 0x108   :  { %v185_v49 = vrot.slane %v184_v48, 1 }
 0x10a   :  { %v186_v50 = vadd.f32 %v185_v49, %v184_v48 }
 0x10c   :  { %v188_v51 = vmul.f32 0.015625, %v186_v50 }
 0x10e   :  { %v189_v52 = vsub.f32 %v1877_v27, %v188_v51  ;;  %v190_v53 = vsub.f32 %v1875_v26, %v188_v51  ;;  %v191_v54 = vsub.f32 %v1881_v33, %v188_v51  ;;  %v192_v55 = vsub.f32 %v1883_v34, %v188_v51 }
 0x10f   :  { %v193_v58 = vsub.f32 %v1886_v36, %v188_v51  ;;  %v194_v61 = vsub.f32 %v1889_v38, %v188_v51  ;;  %v195_v0 = vsub.f32 %v1892_v40, %v188_v51  ;;  %v196_v3 = vsub.f32 %v1895_v42, %v188_v51 }
 0x110   :  { %v197_v56 = vmul.f32 %v189_v52, %v189_v52  ;;  %v198_v57 = vmul.f32 %v190_v53, %v190_v53  ;;  %v199_v59 = vmul.f32 %v191_v54, %v191_v54  ;;  %v200_v62 = vmul.f32 %v192_v55, %v192_v55 }
 0x111   :  { %v201_v1 = vmul.f32 %v193_v58, %v193_v58  ;;  %v202_v4 = vmul.f32 %v194_v61, %v194_v61  ;;  %v203_v6 = vmul.f32 %v195_v0, %v195_v0  ;;  %v204_v8 = vmul.f32 %v196_v3, %v196_v3 }
 0x112   :  { %v205_v60 = vadd.f32 %v198_v57, %v197_v56 }
 0x114   :  { %v206_v63 = vadd.f32 %v205_v60, %v199_v59  ;;  %v467_v60 = vld [vmem:[#allocation2 + $0x30] sm:$0xff] }
 0x116   :  { %v207_v2 = vadd.f32 %v206_v63, %v200_v62  ;;  %v469_v63 = vld [vmem:[#allocation2 + $0x40] sm:$0xff] }
 0x118   :  { %v208_v5 = vadd.f32 %v207_v2, %v201_v1  ;;  %v909_v2 = vld [vmem:[#allocation2 + $0xa0] sm:$0xff] }
 0x11a   :  { %v209_v7 = vadd.f32 %v208_v5, %v202_v4 }
 0x11c   :  { %v210_v9 = vadd.f32 %v209_v7, %v203_v6 }
 0x11e   :  { %v211_v10 = vadd.f32 %v210_v9, %v204_v8 }
 0x120   :  { %v212_v11 = vrot.slane %v211_v10, 4 }
 0x122   :  { %v213_v12 = vadd.f32 %v212_v11, %v211_v10 }
 0x124   :  { %v214_v13 = vrot.slane %v213_v12, 2 }
 0x126   :  { %v215_v14 = vadd.f32 %v214_v13, %v213_v12 }
 0x128   :  { %v216_v15 = vrot.slane %v215_v14, 1 }
 0x12a   :  { %v217_v16 = vadd.f32 %v216_v15, %v215_v14 }
 0x12c   :  { %v218_v17 = vmul.f32 0.015625, %v217_v16 }
 0x12e   :  { %v219_v21 = vadd.f32 1e-05, %v218_v17 }
 0x130   :  { %1763 = vrsqrt.f32 %v219_v21 }
 0x13a   :  { %v1764_v24 = vpop.eup %1763 }
 0x13b   :  { %v221_v25 = vmul.f32 %v1764_v24, %v1870_v20 }
 0x13d   :  { %v225_v28 = vrot.slane %v221_v25, %v224_v22 }
 0x13f   :  { %v226_v30 = vmul.f32 %v225_v28, %v189_v52  ;;  %v227_v31 = vmul.f32 %v225_v28, %v190_v53  ;;  %v228_v32 = vmul.f32 %v225_v28, %v191_v54  ;;  %v229_v35 = vmul.f32 %v225_v28, %v192_v55 }
 0x140   :  { %v230_v43 = vmul.f32 %v225_v28, %v193_v58  ;;  %v231_v47 = vmul.f32 %v225_v28, %v194_v61  ;;  %v232_v48 = vmul.f32 %v225_v28, %v195_v0  ;;  %v233_v53 = vmul.f32 %v225_v28, %v196_v3  ;;  %v468_v61 = vld [vmem:[#allocation2 + $0x38] sm:$0xff]  ;;  %v470_v0 = vld [vmem:[#allocation2 + $0x48] sm:$0xff] }
 0x141   :  { %v238_v37 = vadd.f32 %v237_v29, %v226_v30  ;;  %v239_v39 = vadd.f32 %v237_v29, %v227_v31  ;;  %v240_v41 = vadd.f32 %v237_v29, %v228_v32  ;;  %v241_v46 = vadd.f32 %v237_v29, %v229_v35  ;;  %v910_v3 = vld [vmem:[#allocation2 + $0xa8] sm:$0xff] }
 0x142   :  { %v242_v50 = vadd.f32 %v237_v29, %v230_v43  ;;  %v243_v52 = vadd.f32 %v237_v29, %v231_v47  ;;  %v244_v55 = vadd.f32 %v237_v29, %v232_v48  ;;  %v245_v57 = vadd.f32 %v237_v29, %v233_v53 }
 0x143   :  { %v246_v44 = vmax.f32 %v238_v37, 0.0  ;;  %v247_v45 = vmax.f32 %v239_v39, 0.0  ;;  %v248_v49 = vmax.f32 %v240_v41, 0.0  ;;  %v249_v51 = vmax.f32 %v241_v46, 0.0 }
 0x144   :  { %v250_v54 = vmax.f32 %v242_v50, 0.0  ;;  %v251_v56 = vmax.f32 %v243_v52, 0.0  ;;  %v252_v58 = vmax.f32 %v244_v55, 0.0  ;;  %v253_v59 = vmax.f32 %v245_v57, 0.0 }
 0x145   :  { %1570 = vmatprep.mubr.msk.f32.mxu1 %vm258_vm1, %v246_v44  ;;  %v1702_v62 = vpack.c.bf16 %v468_v61, %v467_v60  ;;  %v1706_v1 = vpack.c.bf16 %v470_v0, %v469_v63  ;;  %v1923_v4 = vpack.c.bf16 %v910_v3, %v909_v2 }
 0x146   :  { %1571 = vmatmul.mubr.msk.f32.vlgmr.msra.gmra.mrb[4].mxu1 %vm258_vm1, %v247_v45 }
 0x147   :  { %1573 = vmatprep.mubr.msk.f32.mxu1 %vm258_vm1, %v248_v49  ;;  %1703 = vmatprep.subr.bf16.mxu0 %v1702_v62 }
 0x148   :  { %1705 = vmatpush3.bf16.msra.mxu0 %v1702_v62 }
 0x149   :  { %1707 = vmatprep.subr.bf16.mxu0 %v1706_v1 }
 0x14a   :  { %1574 = vmatmul.mubr.msk.f32.gmra.mrb[6].mxu1 %vm258_vm1, %v249_v51 }
 0x14b   :  { %1576 = vmatprep.mubr.msk.f32.mxu1 %vm258_vm1, %v250_v54 }
 0x14c   :  { %1709 = vmatpush3.bf16.msra.mxu0 %v1706_v1 }
 0x14d   :  { %1719 = vmatprep.subr.bf16.mxu0 %v1923_v4 }
 0x14e   :  { %1577 = vmatmul.mubr.msk.f32.gmra.mrb[8].mxu1 %vm258_vm1, %v251_v56 }
 0x14f   :  { %1579 = vmatprep.mubr.msk.f32.mxu1 %vm258_vm1, %v252_v58 }
 0x152   :  { %1580 = vmatmul.mubr.msk.f32.gmra.mrb[10].mxu1 %vm258_vm1, %v253_v59 }
 0x219   :  { %v1572_v5 = vpop.f32.mrb[4].mxu1 }
 0x21a   :  { %v349_v6 = vpop.f32.mrb[5].mxu1 }
 0x21b   :  { %v388_v7 = vadd.f32 %v1572_v5, %v349_v6 }
 0x21d   :  { %v1575_v8 = vpop.f32.mrb[6].mxu1 }
 0x21e   :  { %v359_v9 = vpop.f32.mrb[7].mxu1 }
 0x21f   :  { %v389_v10 = vadd.f32 %v388_v7, %v359_v9 }
 0x221   :  { %v1578_v11 = vpop.f32.mrb[8].mxu1  ;;  %v390_v12 = vadd.f32 %v1575_v8, %v389_v10 }
 0x222   :  { %v369_v13 = vpop.f32.mrb[9].mxu1 }
 0x223   :  { %v391_v14 = vadd.f32 %v390_v12, %v369_v13 }
 0x225   :  { %v1581_v15 = vpop.f32.mrb[10].mxu1  ;;  %v392_v16 = vadd.f32 %v1578_v11, %v391_v14 }
 0x226   :  { %v379_v17 = vpop.f32.mrb[11].mxu1 }
 0x227   :  { %v393_v21 = vadd.f32 %v392_v16, %v379_v17 }
 0x229   :  { %v394_v24 = vadd.f32 %v1581_v15, %v393_v21 }
 0x22b   :  { %v395_v25 = vrot.slane %v394_v24, 4 }
 0x22d   :  { %v396_v28 = vadd.f32 %v395_v25, %v394_v24 }
 0x22f   :  { %v397_v29 = vrot.slane %v396_v28, 2 }
 0x231   :  { %v398_v30 = vadd.f32 %v397_v29, %v396_v28 }
 0x233   :  { %v399_v31 = vrot.slane %v398_v30, 1 }
 0x235   :  { %v400_v32 = vadd.f32 %v399_v31, %v398_v30 }
 0x237   :  { %v401_v35 = vmul.f32 0.015625, %v400_v32 }
 0x239   :  { %v402_v37 = vsub.f32 %v349_v6, %v401_v35  ;;  %v403_v39 = vsub.f32 %v1572_v5, %v401_v35  ;;  %v404_v41 = vsub.f32 %v359_v9, %v401_v35  ;;  %v405_v43 = vsub.f32 %v1575_v8, %v401_v35 }
 0x23a   :  { %v406_v44 = vsub.f32 %v369_v13, %v401_v35  ;;  %v407_v45 = vsub.f32 %v1578_v11, %v401_v35  ;;  %v408_v46 = vsub.f32 %v379_v17, %v401_v35  ;;  %v409_v47 = vsub.f32 %v1581_v15, %v401_v35 }
 0x23b   :  { %v410_v48 = vmul.f32 %v402_v37, %v402_v37  ;;  %v411_v49 = vmul.f32 %v403_v39, %v403_v39  ;;  %v412_v50 = vmul.f32 %v404_v41, %v404_v41  ;;  %v413_v52 = vmul.f32 %v405_v43, %v405_v43 }
 0x23c   :  { %v414_v54 = vmul.f32 %v406_v44, %v406_v44  ;;  %v415_v56 = vmul.f32 %v407_v45, %v407_v45  ;;  %v416_v58 = vmul.f32 %v408_v46, %v408_v46  ;;  %v417_v60 = vmul.f32 %v409_v47, %v409_v47 }
 0x23d   :  { %v418_v51 = vadd.f32 %v411_v49, %v410_v48  ;;  %v437_v8 = vsub.s32 3, %v1864_v18  ;;  %v449_v9 = vsub.s32 4, %v1864_v18 }
 0x23f   :  { %v419_v53 = vadd.f32 %v418_v51, %v412_v50  ;;  %v450_v13 = vrot.slane %v1870_v20, %v449_v9  ;;  %v911_v51 = vld [vmem:[#allocation2 + $0xb0] sm:$0xff] }
 0x241   :  { %v420_v55 = vadd.f32 %v419_v53, %v413_v52  ;;  %v691_v53 = vld [vmem:[#allocation2 + $0x50] sm:$0xff] }
 0x243   :  { %v421_v57 = vadd.f32 %v420_v55, %v414_v54  ;;  %v692_v54 = vld [vmem:[#allocation2 + $0x58] sm:$0xff] }
 0x244   :  { %v1710_v55 = vpack.c.bf16 %v692_v54, %v691_v53 }
 0x245   :  { %v422_v59 = vadd.f32 %v421_v57, %v415_v56  ;;  %v693_v56 = vld [vmem:[#allocation2 + $0x60] sm:$0xff]  ;;  %v694_v57 = vld [vmem:[#allocation2 + $0x68] sm:$0xff] }
 0x246   :  { %1711 = vmatprep.subr.bf16.mxu1 %v1710_v55 }
 0x247   :  { %v423_v61 = vadd.f32 %v422_v59, %v416_v58  ;;  %1713 = vmatpush3.bf16.msra.mxu1 %v1710_v55  ;;  %v1714_v58 = vpack.c.bf16 %v694_v57, %v693_v56  ;;  %v473_v59 = vsub.s32 5, %v1864_v18 }
 0x249   :  { %v424_v62 = vadd.f32 %v423_v61, %v417_v60  ;;  %1715 = vmatprep.subr.bf16.mxu1 %v1714_v58  ;;  %v474_v60 = vrot.slane %v1870_v20, %v473_v59 }
 0x24b   :  { %v425_v63 = vrot.slane %v424_v62, 4  ;;  %1717 = vmatpush3.bf16.msra.mxu1 %v1714_v58 }
 0x24d   :  { %v426_v0 = vadd.f32 %v425_v63, %v424_v62 }
 0x24f   :  { %v427_v1 = vrot.slane %v426_v0, 2 }
 0x251   :  { %v428_v2 = vadd.f32 %v427_v1, %v426_v0 }
 0x253   :  { %v429_v3 = vrot.slane %v428_v2, 1 }
 0x255   :  { %v430_v5 = vadd.f32 %v429_v3, %v428_v2 }
 0x257   :  { %v431_v6 = vmul.f32 0.015625, %v430_v5 }
 0x259   :  { %v432_v7 = vadd.f32 1e-05, %v431_v6 }
 0x25b   :  { %1765 = vrsqrt.f32 %v432_v7 }
 0x265   :  { %v1766_v10 = vpop.eup %1765 }
 0x266   :  { %v434_v11 = vmul.f32 %v1766_v10, %v1870_v20 }
 0x268   :  { %v438_v12 = vrot.slane %v434_v11, %v437_v8 }
 0x26a   :  { %v445_v14 = vmul.f32 %v438_v12, %v408_v46  ;;  %v439_v15 = vmul.f32 %v438_v12, %v402_v37  ;;  %v440_v16 = vmul.f32 %v438_v12, %v403_v39  ;;  %v441_v17 = vmul.f32 %v438_v12, %v404_v41 }
 0x26b   :  { %v442_v21 = vmul.f32 %v438_v12, %v405_v43  ;;  %v443_v24 = vmul.f32 %v438_v12, %v406_v44  ;;  %v444_v25 = vmul.f32 %v438_v12, %v407_v45  ;;  %v446_v28 = vmul.f32 %v438_v12, %v409_v47 }
 0x26c   :  { %v451_v29 = vadd.f32 %v450_v13, %v439_v15  ;;  %v452_v30 = vadd.f32 %v450_v13, %v440_v16  ;;  %v453_v31 = vadd.f32 %v450_v13, %v441_v17  ;;  %v457_v41 = vadd.f32 %v450_v13, %v445_v14 }
 0x26d   :  { %v454_v48 = vadd.f32 %v450_v13, %v442_v21  ;;  %v455_v50 = vadd.f32 %v450_v13, %v443_v24  ;;  %v456_v39 = vadd.f32 %v450_v13, %v444_v25  ;;  %v458_v45 = vadd.f32 %v450_v13, %v446_v28 }
 0x26e   :  { %v459_v32 = vmax.f32 %v451_v29, 0.0  ;;  %v460_v35 = vmax.f32 %v452_v30, 0.0  ;;  %v461_v49 = vmax.f32 %v453_v31, 0.0  ;;  %v465_v46 = vmax.f32 %v457_v41, 0.0 }
 0x26f   :  { %v462_v37 = vmax.f32 %v454_v48, 0.0  ;;  %v463_v43 = vmax.f32 %v455_v50, 0.0  ;;  %v464_v44 = vmax.f32 %v456_v39, 0.0  ;;  %v466_v47 = vmax.f32 %v458_v45, 0.0 }
 0x270   :  { %1590 = vmatprep.mubr.msk.f32.mxu0 %vm258_vm1, %v459_v32 }
 0x271   :  { %1591 = vmatmul.mubr.msk.f32.vlgmr.msra.gmra.mrb[4].mxu0 %vm258_vm1, %v460_v35 }
 0x272   :  { %1593 = vmatprep.mubr.msk.f32.mxu0 %vm258_vm1, %v461_v49  ;;  %1721 = vmatpush3.bf16.msra.mxu0 %v1923_v4  ;;  %v912_v4 = vld [vmem:[#allocation2 + $0xb8] sm:$0xff] }
 0x273   :  { %v1722_v52 = vpack.c.bf16 %v912_v4, %v911_v51 }
 0x275   :  { %1594 = vmatmul.mubr.msk.f32.gmra.mrb[6].mxu0 %vm258_vm1, %v462_v37  ;;  %1723 = vmatprep.subr.bf16.mxu0 %v1722_v52 }
 0x276   :  { %1596 = vmatprep.mubr.msk.f32.mxu0 %vm258_vm1, %v463_v43  ;;  %1725 = vmatpush3.bf16.msra.mxu0 %v1722_v52 }
 0x279   :  { %1597 = vmatmul.mubr.msk.f32.gmra.mrb[8].mxu0 %vm258_vm1, %v464_v44 }
 0x27a   :  { %1599 = vmatprep.mubr.msk.f32.mxu0 %vm258_vm1, %v465_v46 }
 0x27d   :  { %1600 = vmatmul.mubr.msk.f32.gmra.mrb[10].mxu0 %vm258_vm1, %v466_v47 }
 0x344   :  { %v1592_v61 = vpop.f32.mrb[4].mxu0 }
 0x345   :  { %v571_v62 = vadd.f32 %v1592_v61, %v474_v60  ;;  %v565_v63 = vpop.f32.mrb[5].mxu0 }
 0x346   :  { %v566_v0 = vadd.f32 %v565_v63, %v474_v60 }
 0x347   :  { %v605_v1 = vadd.f32 %v571_v62, %v1875_v26 }
 0x348   :  { %v604_v2 = vadd.f32 %v566_v0, %v1877_v27  ;;  %v1595_v3 = vpop.f32.mrb[6].mxu0 }
 0x349   :  { %v581_v5 = vadd.f32 %v1595_v3, %v474_v60  ;;  %v575_v6 = vpop.f32.mrb[7].mxu0 }
 0x34a   :  { %v612_v7 = vadd.f32 %v605_v1, %v604_v2  ;;  %v576_v10 = vadd.f32 %v575_v6, %v474_v60  ;;  %1630 = vmatprep.mubr.msk.f32.mxu0 %vm258_vm1, %v604_v2 }
 0x34b   :  { %1631 = vmatmul.mubr.msk.f32.vlgmr.msra.gmra.mrb[12].mxu0 %vm258_vm1, %v605_v1  ;;  %v607_v13 = vadd.f32 %v581_v5, %v1883_v34 }
 0x34c   :  { %v606_v11 = vadd.f32 %v576_v10, %v1881_v33  ;;  %v1598_v12 = vpop.f32.mrb[8].mxu0 }
 0x34d   :  { %v591_v14 = vadd.f32 %v1598_v12, %v474_v60  ;;  %v585_v15 = vpop.f32.mrb[9].mxu0  ;;  %v661_v12 = vsub.s32 6, %v1864_v18 }
 0x34e   :  { %v613_v16 = vadd.f32 %v612_v7, %v606_v11  ;;  %v586_v26 = vadd.f32 %v585_v15, %v474_v60  ;;  %1633 = vmatprep.mubr.msk.f32.mxu0 %vm258_vm1, %v606_v11 }
 0x34f   :  { %1634 = vmatmul.mubr.msk.f32.gmra.mrb[14].mxu0 %vm258_vm1, %v607_v13  ;;  %v609_v24 = vadd.f32 %v591_v14, %v1889_v38 }
 0x350   :  { %v608_v27 = vadd.f32 %v586_v26, %v1886_v36  ;;  %v614_v17 = vadd.f32 %v613_v16, %v607_v13  ;;  %v1601_v21 = vpop.f32.mrb[10].mxu0 }
 0x351   :  { %v601_v25 = vadd.f32 %v1601_v21, %v474_v60  ;;  %v595_v28 = vpop.f32.mrb[11].mxu0 }
 0x352   :  { %v615_v33 = vadd.f32 %v614_v17, %v608_v27  ;;  %v596_v29 = vadd.f32 %v595_v28, %v474_v60  ;;  %1636 = vmatprep.mubr.msk.f32.mxu0 %vm258_vm1, %v608_v27 }
 0x353   :  { %1637 = vmatmul.mubr.msk.f32.gmra.mrb[16].mxu0 %vm258_vm1, %v609_v24  ;;  %v611_v31 = vadd.f32 %v601_v25, %v1895_v42 }
 0x354   :  { %v610_v34 = vadd.f32 %v596_v29, %v1892_v40  ;;  %v616_v30 = vadd.f32 %v615_v33, %v609_v24 }
 0x356   :  { %v617_v32 = vadd.f32 %v616_v30, %v610_v34  ;;  %1639 = vmatprep.mubr.msk.f32.mxu0 %vm258_vm1, %v610_v34 }
 0x357   :  { %1640 = vmatmul.mubr.msk.f32.gmra.mrb[18].mxu0 %vm258_vm1, %v611_v31 }
 0x358   :  { %v618_v36 = vadd.f32 %v617_v32, %v611_v31 }
 0x35a   :  { %v619_v38 = vrot.slane %v618_v36, 4 }
 0x35c   :  { %v620_v35 = vadd.f32 %v619_v38, %v618_v36 }
 0x35e   :  { %v621_v48 = vrot.slane %v620_v35, 2 }
 0x360   :  { %v622_v49 = vadd.f32 %v621_v48, %v620_v35 }
 0x362   :  { %v623_v50 = vrot.slane %v622_v49, 1 }
 0x364   :  { %v624_v37 = vadd.f32 %v623_v50, %v622_v49 }
 0x366   :  { %v625_v39 = vmul.f32 0.015625, %v624_v37 }
 0x368   :  { %v626_v41 = vsub.f32 %v604_v2, %v625_v39  ;;  %v627_v43 = vsub.f32 %v605_v1, %v625_v39  ;;  %v628_v44 = vsub.f32 %v606_v11, %v625_v39  ;;  %v629_v40 = vsub.f32 %v607_v13, %v625_v39 }
 0x369   :  { %v630_v45 = vsub.f32 %v608_v27, %v625_v39  ;;  %v631_v46 = vsub.f32 %v609_v24, %v625_v39  ;;  %v632_v42 = vsub.f32 %v610_v34, %v625_v39  ;;  %v633_v47 = vsub.f32 %v611_v31, %v625_v39 }
 0x36a   :  { %v634_v51 = vmul.f32 %v626_v41, %v626_v41  ;;  %v635_v4 = vmul.f32 %v627_v43, %v627_v43  ;;  %v636_v52 = vmul.f32 %v628_v44, %v628_v44  ;;  %v637_v54 = vmul.f32 %v629_v40, %v629_v40 }
 0x36b   :  { %v638_v56 = vmul.f32 %v630_v45, %v630_v45  ;;  %v639_v58 = vmul.f32 %v631_v46, %v631_v46  ;;  %v640_v60 = vmul.f32 %v632_v42, %v632_v42  ;;  %v641_v62 = vmul.f32 %v633_v47, %v633_v47 }
 0x36c   :  { %v642_v53 = vadd.f32 %v635_v4, %v634_v51  ;;  %v673_v13 = vsub.s32 7, %v1864_v18  ;;  %v907_v4 = vld [vmem:[#allocation2 + $0x90] sm:$0xff] }
 0x36e   :  { %v643_v55 = vadd.f32 %v642_v53, %v636_v52  ;;  %v674_v26 = vrot.slane %v1870_v20, %v673_v13  ;;  %v908_v52 = vld [vmem:[#allocation2 + $0x98] sm:$0xff] }
 0x36f   :  { %v1734_v53 = vpack.c.bf16 %v908_v52, %v907_v4 }
 0x370   :  { %v644_v57 = vadd.f32 %v643_v55, %v637_v54 }
 0x372   :  { %v645_v59 = vadd.f32 %v644_v57, %v638_v56 }
 0x374   :  { %v646_v61 = vadd.f32 %v645_v59, %v639_v58 }
 0x376   :  { %v647_v63 = vadd.f32 %v646_v61, %v640_v60 }
 0x378   :  { %v648_v0 = vadd.f32 %v647_v63, %v641_v62 }
 0x37a   :  { %v649_v1 = vrot.slane %v648_v0, 4 }
 0x37c   :  { %v650_v2 = vadd.f32 %v649_v1, %v648_v0 }
 0x37e   :  { %v651_v3 = vrot.slane %v650_v2, 2 }
 0x380   :  { %v652_v5 = vadd.f32 %v651_v3, %v650_v2 }
 0x382   :  { %v653_v6 = vrot.slane %v652_v5, 1 }
 0x384   :  { %v654_v7 = vadd.f32 %v653_v6, %v652_v5 }
 0x386   :  { %v655_v10 = vmul.f32 0.015625, %v654_v7 }
 0x388   :  { %v656_v11 = vadd.f32 1e-05, %v655_v10 }
 0x38a   :  { %1767 = vrsqrt.f32 %v656_v11 }
 0x394   :  { %v1768_v14 = vpop.eup %1767 }
 0x395   :  { %v658_v15 = vmul.f32 %v1768_v14, %v1870_v20 }
 0x397   :  { %v662_v16 = vrot.slane %v658_v15, %v661_v12 }
 0x399   :  { %v669_v27 = vmul.f32 %v662_v16, %v632_v42  ;;  %v663_v17 = vmul.f32 %v662_v16, %v626_v41  ;;  %v664_v21 = vmul.f32 %v662_v16, %v627_v43  ;;  %v665_v24 = vmul.f32 %v662_v16, %v628_v44  ;;  %v905_v42 = vld [vmem:[#allocation2 + $0x80] sm:$0xff] }
 0x39a   :  { %v666_v25 = vmul.f32 %v662_v16, %v629_v40  ;;  %v667_v28 = vmul.f32 %v662_v16, %v630_v45  ;;  %v668_v33 = vmul.f32 %v662_v16, %v631_v46  ;;  %v670_v29 = vmul.f32 %v662_v16, %v633_v47  ;;  %v903_v40 = vld [vmem:[#allocation2 + $0x70] sm:$0xff]  ;;  %v904_v45 = vld [vmem:[#allocation2 + $0x78] sm:$0xff]  ;;  %v906_v47 = vld [vmem:[#allocation2 + $0x88] sm:$0xff] }
 0x39b   :  { %v675_v34 = vadd.f32 %v674_v26, %v663_v17  ;;  %v676_v30 = vadd.f32 %v674_v26, %v664_v21  ;;  %v677_v31 = vadd.f32 %v674_v26, %v665_v24  ;;  %v681_v37 = vadd.f32 %v674_v26, %v669_v27 }
 0x39c   :  { %v678_v38 = vadd.f32 %v674_v26, %v666_v25  ;;  %v679_v48 = vadd.f32 %v674_v26, %v667_v28  ;;  %v680_v49 = vadd.f32 %v674_v26, %v668_v33  ;;  %v682_v41 = vadd.f32 %v674_v26, %v670_v29 }
 0x39d   :  { %v683_v32 = vmax.f32 %v675_v34, 0.0  ;;  %v684_v36 = vmax.f32 %v676_v30, 0.0  ;;  %v685_v35 = vmax.f32 %v677_v31, 0.0  ;;  %v689_v43 = vmax.f32 %v681_v37, 0.0 }
 0x39e   :  { %v686_v20 = vmax.f32 %v678_v38, 0.0  ;;  %v687_v50 = vmax.f32 %v679_v48, 0.0  ;;  %v688_v39 = vmax.f32 %v680_v49, 0.0  ;;  %v690_v44 = vmax.f32 %v682_v41, 0.0 }
 0x39f   :  { %1610 = vmatprep.mubr.msk.f32.mxu1 %vm258_vm1, %v683_v32  ;;  %v1726_v46 = vpack.c.bf16 %v904_v45, %v903_v40  ;;  %v1730_v51 = vpack.c.bf16 %v906_v47, %v905_v42  ;;  %v1976_v47 = vld [vmem:[%s2043_s2 + $0x8] sm:$0xff] }
 0x3a0   :  { %1611 = vmatmul.mubr.msk.f32.vlgmr.msra.gmra.mrb[12].mxu1 %vm258_vm1, %v684_v36 }
 0x3a1   :  { %1613 = vmatprep.mubr.msk.f32.mxu1 %vm258_vm1, %v685_v35  ;;  %1727 = vmatprep.subr.bf16.mxu0 %v1726_v46 }
 0x3a2   :  { %1729 = vmatpush3.bf16.msra.mxu0 %v1726_v46 }
 0x3a3   :  { %1731 = vmatprep.subr.bf16.mxu0 %v1730_v51 }
 0x3a4   :  { %1614 = vmatmul.mubr.msk.f32.gmra.mrb[14].mxu1 %vm258_vm1, %v686_v20 }
 0x3a5   :  { %1616 = vmatprep.mubr.msk.f32.mxu1 %vm258_vm1, %v687_v50 }
 0x3a6   :  { %1733 = vmatpush3.bf16.msra.mxu0 %v1730_v51 }
 0x3a7   :  { %1735 = vmatprep.subr.bf16.mxu0 %v1734_v53 }
 0x3a8   :  { %1617 = vmatmul.mubr.msk.f32.gmra.mrb[16].mxu1 %vm258_vm1, %v688_v39 }
 0x3a9   :  { %1619 = vmatprep.mubr.msk.f32.mxu1 %vm258_vm1, %v689_v43 }
 0x3aa   :  { %1737 = vmatpush3.bf16.msra.mxu0 %v1734_v53  ;;  %v886_v53 = vrot.slane %v1976_v47, %v224_v22 }
 0x3ac   :  { %1620 = vmatmul.mubr.msk.f32.gmra.mrb[18].mxu1 %vm258_vm1, %v690_v44 }
 0x473   :  { %v1612_v54 = vpop.f32.mrb[12].mxu1 }
 0x474   :  { %v785_v55 = vpop.f32.mrb[13].mxu1 }
 0x475   :  { %v824_v56 = vadd.f32 %v1612_v54, %v785_v55 }
 0x477   :  { %v1615_v57 = vpop.f32.mrb[14].mxu1 }
 0x478   :  { %v795_v58 = vpop.f32.mrb[15].mxu1 }
 0x479   :  { %v825_v59 = vadd.f32 %v824_v56, %v795_v58 }
 0x47b   :  { %v1618_v60 = vpop.f32.mrb[16].mxu1  ;;  %v826_v61 = vadd.f32 %v1615_v57, %v825_v59 }
 0x47c   :  { %v805_v62 = vpop.f32.mrb[17].mxu1 }
 0x47d   :  { %v827_v63 = vadd.f32 %v826_v61, %v805_v62 }
 0x47f   :  { %v1621_v0 = vpop.f32.mrb[18].mxu1  ;;  %v828_v1 = vadd.f32 %v1618_v60, %v827_v63 }
 0x480   :  { %v815_v2 = vpop.f32.mrb[19].mxu1 }
 0x481   :  { %v829_v3 = vadd.f32 %v828_v1, %v815_v2 }
 0x483   :  { %v830_v5 = vadd.f32 %v1621_v0, %v829_v3 }
 0x485   :  { %v831_v6 = vrot.slane %v830_v5, 4 }
 0x487   :  { %v832_v7 = vadd.f32 %v831_v6, %v830_v5 }
 0x489   :  { %v833_v10 = vrot.slane %v832_v7, 2 }
 0x48b   :  { %v834_v11 = vadd.f32 %v833_v10, %v832_v7 }
 0x48d   :  { %v835_v12 = vrot.slane %v834_v11, 1 }
 0x48f   :  { %v836_v13 = vadd.f32 %v835_v12, %v834_v11 }
 0x491   :  { %v837_v14 = vmul.f32 0.015625, %v836_v13 }
 0x493   :  { %v838_v15 = vsub.f32 %v785_v55, %v837_v14  ;;  %v839_v16 = vsub.f32 %v1612_v54, %v837_v14  ;;  %v840_v26 = vsub.f32 %v795_v58, %v837_v14  ;;  %v841_v27 = vsub.f32 %v1615_v57, %v837_v14 }
 0x494   :  { %v842_v17 = vsub.f32 %v805_v62, %v837_v14  ;;  %v843_v21 = vsub.f32 %v1618_v60, %v837_v14  ;;  %v844_v24 = vsub.f32 %v815_v2, %v837_v14  ;;  %v845_v25 = vsub.f32 %v1621_v0, %v837_v14 }
 0x495   :  { %v846_v28 = vmul.f32 %v838_v15, %v838_v15  ;;  %v847_v33 = vmul.f32 %v839_v16, %v839_v16  ;;  %v848_v29 = vmul.f32 %v840_v26, %v840_v26  ;;  %v849_v30 = vmul.f32 %v841_v27, %v841_v27 }
 0x496   :  { %v850_v32 = vmul.f32 %v842_v17, %v842_v17  ;;  %v851_v38 = vmul.f32 %v843_v21, %v843_v21  ;;  %v852_v48 = vmul.f32 %v844_v24, %v844_v24  ;;  %v853_v49 = vmul.f32 %v845_v25, %v845_v25 }
 0x497   :  { %v854_v34 = vadd.f32 %v847_v33, %v846_v28 }
 0x499   :  { %v855_v31 = vadd.f32 %v854_v34, %v848_v29 }
 0x49b   :  { %v856_v36 = vadd.f32 %v855_v31, %v849_v30 }
 0x49d   :  { %v857_v35 = vadd.f32 %v856_v36, %v850_v32 }
 0x49f   :  { %v858_v20 = vadd.f32 %v857_v35, %v851_v38 }
 0x4a1   :  { %v859_v50 = vadd.f32 %v858_v20, %v852_v48 }
 0x4a3   :  { %v860_v37 = vadd.f32 %v859_v50, %v853_v49 }
 0x4a5   :  { %v861_v39 = vrot.slane %v860_v37, 4 }
 0x4a7   :  { %v862_v41 = vadd.f32 %v861_v39, %v860_v37 }
 0x4a9   :  { %v863_v43 = vrot.slane %v862_v41, 2 }
 0x4ab   :  { %v864_v44 = vadd.f32 %v863_v43, %v862_v41 }
 0x4ad   :  { %v865_v40 = vrot.slane %v864_v44, 1 }
 0x4af   :  { %v866_v45 = vadd.f32 %v865_v40, %v864_v44 }
 0x4b1   :  { %v867_v46 = vmul.f32 0.015625, %v866_v45 }
 0x4b3   :  { %v868_v42 = vadd.f32 1e-05, %v867_v46 }
 0x4b5   :  { %1769 = vrsqrt.f32 %v868_v42 }
 0x4bf   :  { %v1770_v51 = vpop.eup %1769 }
 0x4c0   :  { %v870_v4 = vmul.f32 %v1770_v51, %v1976_v47 }
 0x4c2   :  { %v874_v52 = vrot.slane %v870_v4, %v42_v19 }
 0x4c4   :  { %v881_v54 = vmul.f32 %v874_v52, %v844_v24  ;;  %v875_v55 = vmul.f32 %v874_v52, %v838_v15  ;;  %v876_v56 = vmul.f32 %v874_v52, %v839_v16  ;;  %v877_v57 = vmul.f32 %v874_v52, %v840_v26  ;;  %v1243_v15 = vld [vmem:[#allocation2 + $0xc0] sm:$0xff]  ;;  %v1244_v16 = vld [vmem:[#allocation2 + $0xc8] sm:$0xff] }
 0x4c5   :  { %v878_v58 = vmul.f32 %v874_v52, %v841_v27  ;;  %v879_v59 = vmul.f32 %v874_v52, %v842_v17  ;;  %v880_v60 = vmul.f32 %v874_v52, %v843_v21  ;;  %v882_v61 = vmul.f32 %v874_v52, %v845_v25  ;;  %v1245_v27 = vld [vmem:[#allocation2 + $0xd0] sm:$0xff]  ;;  %v1246_v17 = vld [vmem:[#allocation2 + $0xd8] sm:$0xff]  ;;  %v1247_v24 = vld [vmem:[#allocation2 + $0xe0] sm:$0xff] }
 0x4c6   :  { %v887_v62 = vadd.f32 %v886_v53, %v875_v55  ;;  %v888_v63 = vadd.f32 %v886_v53, %v876_v56  ;;  %v889_v0 = vadd.f32 %v886_v53, %v877_v57  ;;  %v893_v7 = vadd.f32 %v886_v53, %v881_v54  ;;  %v1248_v25 = vld [vmem:[#allocation2 + $0xe8] sm:$0xff] }
 0x4c7   :  { %v890_v3 = vadd.f32 %v886_v53, %v878_v58  ;;  %v891_v5 = vadd.f32 %v886_v53, %v879_v59  ;;  %v892_v6 = vadd.f32 %v886_v53, %v880_v60  ;;  %v894_v12 = vadd.f32 %v886_v53, %v882_v61 }
 0x4c8   :  { %v895_v1 = vmax.f32 %v887_v62, 0.0  ;;  %v896_v2 = vmax.f32 %v888_v63, 0.0  ;;  %v897_v19 = vmax.f32 %v889_v0, 0.0  ;;  %v901_v13 = vmax.f32 %v893_v7, 0.0 }
 0x4c9   :  { %v898_v22 = vmax.f32 %v890_v3, 0.0  ;;  %v899_v10 = vmax.f32 %v891_v5, 0.0  ;;  %v900_v11 = vmax.f32 %v892_v6, 0.0  ;;  %v902_v14 = vmax.f32 %v894_v12, 0.0 }
 0x4ca   :  { %1654 = vmatprep.mubr.msk.f32.mxu0 %vm1042_vm2, %v895_v1  ;;  %v1738_v26 = vpack.c.bf16 %v1244_v16, %v1243_v15  ;;  %v1742_v21 = vpack.c.bf16 %v1246_v17, %v1245_v27  ;;  %v1746_v28 = vpack.c.bf16 %v1248_v25, %v1247_v24 }
 0x4cb   :  { %1655 = vmatmul.mubr.msk.f32.vlgmr.msra.gmra.mrb[12].mxu0 %vm1042_vm2, %v896_v2 }
 0x4cc   :  { %1657 = vmatprep.mubr.msk.f32.mxu0 %vm1042_vm2, %v897_v19  ;;  %1739 = vmatprep.subr.bf16.mxu1 %v1738_v26 }
 0x4cd   :  { %1741 = vmatpush3.bf16.msra.mxu1 %v1738_v26 }
 0x4ce   :  { %1743 = vmatprep.subr.bf16.mxu1 %v1742_v21 }
 0x4cf   :  { %1658 = vmatmul.mubr.msk.f32.gmra.mrb[14].mxu0 %vm1042_vm2, %v898_v22 }
 0x4d0   :  { %1660 = vmatprep.mubr.msk.f32.mxu0 %vm1042_vm2, %v899_v10 }
 0x4d1   :  { %1745 = vmatpush3.bf16.msra.mxu1 %v1742_v21  ;;  %v1234_v21 = vrot.slane %v1976_v47, %v437_v8 }
 0x4d2   :  { %1747 = vmatprep.subr.bf16.mxu1 %v1746_v28 }
 0x4d3   :  { %1661 = vmatmul.mubr.msk.f32.gmra.mrb[16].mxu0 %vm1042_vm2, %v900_v11 }
 0x4d4   :  { %1663 = vmatprep.mubr.msk.f32.mxu0 %vm1042_vm2, %v901_v13 }
 0x4d5   :  { %1749 = vmatpush3.bf16.msra.mxu1 %v1746_v28 }
 0x4d7   :  { %1664 = vmatmul.mubr.msk.f32.gmra.mrb[18].mxu0 %vm1042_vm2, %v902_v14 }
 0x59e   :  { %v1656_v33 = vpop.f32.mrb[12].mxu0 }
 0x59f   :  { %v1133_v29 = vpop.f32.mrb[13].mxu0 }
 0x5a0   :  { %v1172_v34 = vadd.f32 %v1656_v33, %v1133_v29 }
 0x5a2   :  { %v1659_v30 = vpop.f32.mrb[14].mxu0 }
 0x5a3   :  { %v1143_v31 = vpop.f32.mrb[15].mxu0 }
 0x5a4   :  { %v1173_v32 = vadd.f32 %v1172_v34, %v1143_v31 }
 0x5a6   :  { %v1662_v36 = vpop.f32.mrb[16].mxu0  ;;  %v1174_v38 = vadd.f32 %v1659_v30, %v1173_v32 }
 0x5a7   :  { %v1153_v35 = vpop.f32.mrb[17].mxu0 }
 0x5a8   :  { %v1175_v48 = vadd.f32 %v1174_v38, %v1153_v35 }
 0x5aa   :  { %v1665_v20 = vpop.f32.mrb[18].mxu0  ;;  %v1176_v49 = vadd.f32 %v1662_v36, %v1175_v48 }
 0x5ab   :  { %v1163_v50 = vpop.f32.mrb[19].mxu0 }
 0x5ac   :  { %v1177_v37 = vadd.f32 %v1176_v49, %v1163_v50 }
 0x5ae   :  { %v1178_v39 = vadd.f32 %v1665_v20, %v1177_v37 }
 0x5b0   :  { %v1179_v41 = vrot.slane %v1178_v39, 4 }
 0x5b2   :  { %v1180_v43 = vadd.f32 %v1179_v41, %v1178_v39 }
 0x5b4   :  { %v1181_v44 = vrot.slane %v1180_v43, 2 }
 0x5b6   :  { %v1182_v40 = vadd.f32 %v1181_v44, %v1180_v43 }
 0x5b8   :  { %v1183_v45 = vrot.slane %v1182_v40, 1 }
 0x5ba   :  { %v1184_v46 = vadd.f32 %v1183_v45, %v1182_v40 }
 0x5bc   :  { %v1185_v42 = vmul.f32 0.015625, %v1184_v46 }
 0x5be   :  { %v1186_v51 = vsub.f32 %v1133_v29, %v1185_v42  ;;  %v1187_v4 = vsub.f32 %v1656_v33, %v1185_v42  ;;  %v1188_v52 = vsub.f32 %v1143_v31, %v1185_v42  ;;  %v1189_v53 = vsub.f32 %v1659_v30, %v1185_v42 }
 0x5bf   :  { %v1190_v54 = vsub.f32 %v1153_v35, %v1185_v42  ;;  %v1191_v55 = vsub.f32 %v1662_v36, %v1185_v42  ;;  %v1192_v56 = vsub.f32 %v1163_v50, %v1185_v42  ;;  %v1193_v57 = vsub.f32 %v1665_v20, %v1185_v42 }
 0x5c0   :  { %v1194_v58 = vmul.f32 %v1186_v51, %v1186_v51  ;;  %v1195_v59 = vmul.f32 %v1187_v4, %v1187_v4  ;;  %v1196_v60 = vmul.f32 %v1188_v52, %v1188_v52  ;;  %v1197_v62 = vmul.f32 %v1189_v53, %v1189_v53 }
 0x5c1   :  { %v1198_v0 = vmul.f32 %v1190_v54, %v1190_v54  ;;  %v1199_v2 = vmul.f32 %v1191_v55, %v1191_v55  ;;  %v1200_v19 = vmul.f32 %v1192_v56, %v1192_v56  ;;  %v1201_v22 = vmul.f32 %v1193_v57, %v1193_v57 }
 0x5c2   :  { %v1202_v61 = vadd.f32 %v1195_v59, %v1194_v58  ;;  %v1381_v50 = vrot.slane %v1976_v47, %v449_v9 }
 0x5c4   :  { %v1203_v63 = vadd.f32 %v1202_v61, %v1196_v60 }
 0x5c6   :  { %v1204_v1 = vadd.f32 %v1203_v63, %v1197_v62 }
 0x5c8   :  { %v1205_v3 = vadd.f32 %v1204_v1, %v1198_v0 }
 0x5ca   :  { %v1206_v5 = vadd.f32 %v1205_v3, %v1199_v2 }
 0x5cc   :  { %v1207_v6 = vadd.f32 %v1206_v5, %v1200_v19 }
 0x5ce   :  { %v1208_v7 = vadd.f32 %v1207_v6, %v1201_v22 }
 0x5d0   :  { %v1209_v10 = vrot.slane %v1208_v7, 4 }
 0x5d2   :  { %v1210_v11 = vadd.f32 %v1209_v10, %v1208_v7 }
 0x5d4   :  { %v1211_v12 = vrot.slane %v1210_v11, 2 }
 0x5d6   :  { %v1212_v13 = vadd.f32 %v1211_v12, %v1210_v11 }
 0x5d8   :  { %v1213_v14 = vrot.slane %v1212_v13, 1 }
 0x5da   :  { %v1214_v15 = vadd.f32 %v1213_v14, %v1212_v13 }
 0x5dc   :  { %v1215_v16 = vmul.f32 0.015625, %v1214_v15 }
 0x5de   :  { %v1216_v26 = vadd.f32 1e-05, %v1215_v16 }
 0x5e0   :  { %1771 = vrsqrt.f32 %v1216_v26 }
 0x5ea   :  { %v1772_v27 = vpop.eup %1771 }
 0x5eb   :  { %v1218_v17 = vmul.f32 %v1772_v27, %v1976_v47 }
 0x5ed   :  { %v1222_v24 = vrot.slane %v1218_v17, %v236_v23 }
 0x5ef   :  { %v1229_v25 = vmul.f32 %v1222_v24, %v1192_v56  ;;  %v1223_v28 = vmul.f32 %v1222_v24, %v1186_v51  ;;  %v1224_v33 = vmul.f32 %v1222_v24, %v1187_v4  ;;  %v1225_v29 = vmul.f32 %v1222_v24, %v1188_v52 }
 0x5f0   :  { %v1226_v34 = vmul.f32 %v1222_v24, %v1189_v53  ;;  %v1227_v30 = vmul.f32 %v1222_v24, %v1190_v54  ;;  %v1228_v31 = vmul.f32 %v1222_v24, %v1191_v55  ;;  %v1230_v32 = vmul.f32 %v1222_v24, %v1193_v57 }
 0x5f1   :  { %v1235_v36 = vadd.f32 %v1234_v21, %v1223_v28  ;;  %v1236_v38 = vadd.f32 %v1234_v21, %v1224_v33  ;;  %v1237_v35 = vadd.f32 %v1234_v21, %v1225_v29  ;;  %v1241_v20 = vadd.f32 %v1234_v21, %v1229_v25 }
 0x5f2   :  { %v1238_v8 = vadd.f32 %v1234_v21, %v1226_v34  ;;  %v1239_v48 = vadd.f32 %v1234_v21, %v1227_v30  ;;  %v1240_v23 = vadd.f32 %v1234_v21, %v1228_v31  ;;  %v1242_v49 = vadd.f32 %v1234_v21, %v1230_v32 }
 0x5f3   :  { %1678 = vmatprep.mubr.msk.f32.mxu1 %vm1042_vm2, %v1235_v36 }
 0x5f4   :  { %1679 = vmatmul.mubr.msk.f32.vlgmr.msra.gmra.mrb[20].mxu1 %vm1042_vm2, %v1236_v38 }
 0x5f5   :  { %1681 = vmatprep.mubr.msk.f32.mxu1 %vm1042_vm2, %v1237_v35 }
 0x5f8   :  { %1682 = vmatmul.mubr.msk.f32.gmra.mrb[22].mxu1 %vm1042_vm2, %v1238_v8 }
 0x5f9   :  { %1684 = vmatprep.mubr.msk.f32.mxu1 %vm1042_vm2, %v1239_v48 }
 0x5fc   :  { %1685 = vmatmul.mubr.msk.f32.gmra.mrb[24].mxu1 %vm1042_vm2, %v1240_v23 }
 0x5fd   :  { %1687 = vmatprep.mubr.msk.f32.mxu1 %vm1042_vm2, %v1241_v20 }
 0x600   :  { %1688 = vmatmul.mubr.msk.f32.gmra.mrb[26].mxu1 %vm1042_vm2, %v1242_v49 }
 0x6c7   :  { %v1680_v37 = vpop.f32.mrb[20].mxu1 }
 0x6c8   :  { %v1383_v39 = vadd.f32 %v1680_v37, %v1381_v50  ;;  %v1339_v41 = vpop.f32.mrb[21].mxu1 }
 0x6c9   :  { %v1382_v43 = vadd.f32 %v1381_v50, %v1339_v41 }
 0x6ca   :  { %1392 = vst.msk [vmem:[%s2044_s3 + $0x8] sm:$0xff] %vm1390_vm3, %v1383_v39 }
 0x6cb   :  { %1391 = vst.msk [vmem:[%s2044_s3] sm:$0xff] %vm1390_vm3, %v1382_v43  ;;  %v1683_v44 = vpop.f32.mrb[22].mxu1 }
 0x6cc   :  { %v1385_v40 = vadd.f32 %v1683_v44, %v1381_v50  ;;  %v1349_v18 = vpop.f32.mrb[23].mxu1 }
 0x6cd   :  { %v1384_v45 = vadd.f32 %v1381_v50, %v1349_v18 }
 0x6ce   :  { %1394 = vst.msk [vmem:[%s2044_s3 + $0x18] sm:$0xff] %vm1390_vm3, %v1385_v40 }
 0x6cf   :  { %1393 = vst.msk [vmem:[%s2044_s3 + $0x10] sm:$0xff] %vm1390_vm3, %v1384_v45  ;;  %v1686_v9 = vpop.f32.mrb[24].mxu1 }
 0x6d0   :  { %v1387_v47 = vadd.f32 %v1686_v9, %v1381_v50  ;;  %v1359_v46 = vpop.f32.mrb[25].mxu1 }
 0x6d1   :  { %v1386_v42 = vadd.f32 %v1381_v50, %v1359_v46 }
 0x6d2   :  { %1396 = vst.msk [vmem:[%s2044_s3 + $0x28] sm:$0xff] %vm1390_vm3, %v1387_v47 }
 0x6d3   :  { %1395 = vst.msk [vmem:[%s2044_s3 + $0x20] sm:$0xff] %vm1390_vm3, %v1386_v42  ;;  %v1689_v51 = vpop.f32.mrb[26].mxu1 }
 0x6d4   :  { %v1389_v4 = vadd.f32 %v1689_v51, %v1381_v50  ;;  %v1369_v52 = vpop.f32.mrb[27].mxu1 }
 0x6d5   :  { %v1388_v53 = vadd.f32 %v1381_v50, %v1369_v52 }
 0x6d6   :  { %1398 = vst.msk [vmem:[%s2044_s3 + $0x38] sm:$0xff] %vm1390_vm3, %v1389_v4 }
 0x6d7   :  { %1397 = vst.msk [vmem:[%s2044_s3 + $0x30] sm:$0xff] %vm1390_vm3, %v1388_v53 }
 0x6d8   :  { %1403 = vsyncpa [#allocation3], 1 }

</bundles_post_ra>
